<compile_context>
chip_gen: v7x
topology: tpu7x:2x2x1
jax: 0.10.0
libtpu: 0.0.40
codegen_flags: <defaults>
</compile_context>

<pallas_src>
import functools

import jax
import jax.numpy as jnp
from jax.experimental import pallas as pl
from jax.experimental.pallas import tpu as pltpu


def _round_up(x, m):
    return ((x + m - 1) // m) * m


def _yolo_conv_kernel(x_ref, w_ref, scale_ref, bias_ref, o_ref, *, k, neg_slope):
    """One grid step == one (image, H-tile, Cout-tile).

    x_ref:     (TH + k - 1, Wo, k*Cin)  bf16 input row window (halo rows included,
                                        kw taps pre-folded into the channel dim)
    w_ref:     (k, k*Cin, TC)           bf16 folded conv weight for this Cout tile
    scale_ref: (1, TC)                  f32 folded BN scale
    bias_ref:  (1, TC)                  f32 folded BN bias
    o_ref:     (TH, Wo, TC)             f32 output tile (lane-dense: TC % 128 == 0)
    """
    th, wo, tc = o_ref.shape
    kc = w_ref.shape[1]

    # k MXU matmuls with contraction K = k*Cin (kw folded); f32 accumulation.
    # The slices below are leading-dim (major-axis) slices -> no relayout copies.
    acc = jnp.zeros((th * wo, tc), jnp.float32)
    for kh in range(k):  # static, unrolled
        lhs = x_ref[kh:kh + th].reshape(th * wo, kc)
        acc = acc + jnp.dot(lhs, w_ref[kh], preferred_element_type=jnp.float32)

    y = acc * scale_ref[...] + bias_ref[...]      # folded BatchNorm (f32)
    y = jnp.where(y > 0, y, neg_slope * y)        # LeakyReLU(0.1)
    o_ref[...] = y.reshape(th, wo, tc).astype(o_ref.dtype)


def _choose_tile_h(Ho, Wo, Cin, k, tc, budget_bytes=12 * 1024 * 1024):
    """Largest H tile whose per-step VMEM footprint (double-buffered blocks plus
    the in-kernel f32 accumulator) fits a budget safe for v5e / v6e / v7x."""
    kc = k * Cin
    wo_p = max(8, _round_up(Wo, 8))
    kc_p = _round_up(kc, 128)           # lane padding of the small channel dim
    tc_p = _round_up(tc, 128)
    w_b = k * _round_up(kc, 8) * tc_p * 2                # bf16 weights

    def step_bytes(th):
        in_b = (th + k - 1) * wo_p * kc_p * 2            # bf16 halo window
        out_b = th * wo_p * tc_p * 4                     # f32 output block
        acc_b = _round_up(th * wo_p, 8) * tc_p * 4       # f32 accumulator
        return 2 * (in_b + out_b + w_b) + 2 * acc_b

    cap = max(8, _round_up(Ho, 8))
    th = 8
    for cand in (8, 16, 32, 64, 128, 256):
        if cand > cap:
            break
        if step_bytes(cand) <= budget_bytes:
            th = cand
    return th


def yolo_conv_layer(x_nchw, weight_oihw, gamma, beta, running_mean, running_var,
                    stride=1, eps=1e-5, neg_slope=0.1,
                    tile_h=None, tile_cout=128):
    """Pallas implementation of YoloConvLayer.forward (inference-mode BN)."""
    if stride != 1:
        # TODO(synk): strided convolution not implemented in this kernel.
        raise NotImplementedError("stride != 1 not supported")

    N, Cin, H, W = x_nchw.shape
    Cout, Cin_w, k, k_w = weight_oihw.shape
    assert Cin_w == Cin and k_w == k
    pad = (k - 1) // 2
    Ho, Wo = H, W                       # stride 1, 'same' padding
    KC = k * Cin

    # ---- Cout tiling: pad Cout so the output last dim is lane-dense. -------
    TC = int(tile_cout)                 # (v6e: TC=256 can be preferable when Cout >= 256)
    Cout_p = _round_up(Cout, TC)
    n_c = Cout_p // TC

    # ---- H tiling (VMEM-budgeted, generation-safe). -------------------------
    TH = int(tile_h) if tile_h is not None else _choose_tile_h(Ho, Wo, Cin, k, TC)
    n_h = -(-Ho // TH)

    # ---- Host-side layout prep (bf16, channels-last, kw folded into channels).
    x_nhwc = jnp.transpose(x_nchw, (0, 2, 3, 1)).astype(jnp.bfloat16)
    x_pad = jnp.pad(x_nhwc, ((0, 0), (pad, pad), (pad, pad), (0, 0)))  # (N, Hp, Wp, Cin)
    # Fold the kw taps into the channel (lane) dim: contraction per row tap = k*Cin.
    x_kw = jnp.concatenate(
        [x_pad[:, :, kw:kw + Wo, :] for kw in range(k)], axis=-1)      # (N, Hp, Wo, k*Cin)

    # Make sure every H tile's halo window is in range (pad H with zeros if needed).
    Hp = H + 2 * pad
    need_rows = n_h * TH + (k - 1)
    if need_rows > Hp:
        x_kw = jnp.pad(x_kw, ((0, 0), (0, need_rows - Hp), (0, 0), (0, 0)))

    # Per-tile halo windows -> plain blocked BlockSpecs + automatic double-buffering.
    x_win = jnp.stack(
        [x_kw[:, t * TH: t * TH + TH + (k - 1)] for t in range(n_h)], axis=1)
    # x_win: (N, n_h, TH + k - 1, Wo, k*Cin), bf16

    # ---- Weights folded to (k, k*Cin, Cout_p); BN folded to scale/bias. ----
    w_fold = jnp.transpose(weight_oihw, (2, 3, 1, 0)).reshape(k, KC, Cout)
    w_fold = jnp.pad(w_fold.astype(jnp.bfloat16),
                     ((0, 0), (0, 0), (0, Cout_p - Cout)))

    scale = (gamma / jnp.sqrt(running_var + eps)).astype(jnp.float32)
    bias = (beta - running_mean * scale).astype(jnp.float32)
    scale = jnp.pad(scale, (0, Cout_p - Cout)).reshape(1, Cout_p)
    bias = jnp.pad(bias, (0, Cout_p - Cout)).reshape(1, Cout_p)

    grid = (N, n_h, n_c)   # all axes independent -> fully "parallel" (v7x: 2 TCs)

    out = pl.pallas_call(
        functools.partial(_yolo_conv_kernel, k=k, neg_slope=neg_slope),
        out_shape=jax.ShapeDtypeStruct((N, n_h * TH, Wo, Cout_p), jnp.float32),
        grid_spec=pltpu.PrefetchScalarGridSpec(
            num_scalar_prefetch=0,
            grid=grid,
            in_specs=[
                # Halo'd input window; index is independent of c, so it is fetched
                # once per (n, h) and re-used across the inner Cout axis.
                pl.BlockSpec((None, None, TH + k - 1, Wo, KC),
                             lambda n, h, c: (n, h, 0, 0, 0)),
                pl.BlockSpec((k, KC, TC), lambda n, h, c: (0, 0, c)),
                pl.BlockSpec((1, TC), lambda n, h, c: (0, c)),
                pl.BlockSpec((1, TC), lambda n, h, c: (0, c)),
            ],
            out_specs=pl.BlockSpec((None, TH, Wo, TC),
                                   lambda n, h, c: (n, h, 0, c)),
        ),
        compiler_params=pltpu.CompilerParams(
            dimension_semantics=("parallel", "parallel", "parallel"),
            vmem_limit_bytes=48 * 1024 * 1024,   # above default scoped limit, safe on v7x
        ),
    )(x_win, w_fold, scale, bias)

    out = out[:, :Ho, :, :Cout]              # drop H / Cout padding
    return jnp.transpose(out, (0, 3, 1, 2))  # back to NCHW (f32)


def _reference(x_nchw, weight_oihw, gamma, beta, running_mean, running_var,
               eps=1e-5, neg_slope=0.1):
    """Plain-JAX reference mirroring PyTorch Conv2d + eval BatchNorm2d + LeakyReLU.

    Inputs are rounded to bf16 (exactly what the kernel feeds the MXU) and the conv
    runs in f32/HIGHEST precision, so the comparison isolates summation-order error.
    """
    k = weight_oihw.shape[2]
    pad = (k - 1) // 2
    xb = x_nchw.astype(jnp.bfloat16).astype(jnp.float32)
    wb = weight_oihw.astype(jnp.bfloat16).astype(jnp.float32)
    out = jax.lax.conv_general_dilated(
        xb, wb, window_strides=(1, 1), padding=((pad, pad), (pad, pad)),
        dimension_numbers=("NCHW", "OIHW", "NCHW"),
        precision=jax.lax.Precision.HIGHEST)
    scale = gamma / jnp.sqrt(running_var + eps)
    bias = beta - running_mean * scale
    out = out * scale[None, :, None, None] + bias[None, :, None, None]
    return jnp.where(out > 0, out, neg_slope * out)


if __name__ == "__main__":
    key = jax.random.PRNGKey(0)

    def make_case(case_key, N, Cin, H, W, Cout, ksize):
        ks = jax.random.split(case_key, 6)
        x = jax.random.normal(ks[0], (N, Cin, H, W), dtype=jnp.float32)
        w = jax.random.normal(ks[1], (Cout, Cin, ksize, ksize),
                              dtype=jnp.float32) * 0.1
        gamma = 1.0 + 0.1 * jax.random.normal(ks[2], (Cout,), dtype=jnp.float32)
        beta = 0.1 * jax.random.normal(ks[3], (Cout,), dtype=jnp.float32)
        mean = 0.1 * jax.random.normal(ks[4], (Cout,), dtype=jnp.float32)
        var = jnp.abs(1.0 + 0.1 * jax.random.normal(ks[5], (Cout,),
                                                    dtype=jnp.float32))
        return x, w, gamma, beta, mean, var

    k0, k1 = jax.random.split(key)

    # Case 1: nominal small config; default tiles and an explicit tile_h=8 to
    # exercise the multi-H-tile pipeline path.
    args1 = make_case(k0, N=2, Cin=4, H=16, W=16, Cout=8, ksize=3)
    ref1 = _reference(*args1)
    for th in (None, 8):
        out1 = jax.block_until_ready(yolo_conv_layer(*args1, tile_h=th))
        assert out1.shape == ref1.shape, (out1.shape, ref1.shape)
        err1 = float(jnp.max(jnp.abs(out1 - ref1)))
        assert jnp.allclose(out1, ref1, atol=1e-3, rtol=1e-3), err1

    # Case 2: Cout > 128 so the Cout grid axis has 2 tiles (plus 2 H tiles).
    args2 = make_case(k1, N=1, Cin=16, H=16, W=16, Cout=192, ksize=3)
    ref2 = _reference(*args2)
    out2 = jax.block_until_ready(yolo_conv_layer(*args2, tile_h=8))
    assert out2.shape == ref2.shape, (out2.shape, ref2.shape)
    err2 = float(jnp.max(jnp.abs(out2 - ref2)))
    assert jnp.allclose(out2, ref2, atol=1e-3, rtol=1e-3), err2

    print("KERNEL_OK")
</pallas_src>

<mosaic_0001>
module attributes {stable_mosaic.version = 11 : i64} {
  func.func @_yolo_conv_kernel(%arg0: i32, %arg1: i32, %arg2: i32, %arg3: memref<1x1x18x16x12xbf16, #tpu.memory_space<vmem>>, %arg4: memref<3x12x128xbf16, #tpu.memory_space<vmem>>, %arg5: memref<1x128xf32, #tpu.memory_space<vmem>>, %arg6: memref<1x128xf32, #tpu.memory_space<vmem>>, %arg7: memref<1x16x16x128xf32, #tpu.memory_space<vmem>>) attributes {dimension_semantics = [#tpu.dimension_semantics<parallel>, #tpu.dimension_semantics<parallel>, #tpu.dimension_semantics<parallel>], iteration_bounds = array<i64: 2, 1, 1>, scalar_prefetch = 0 : i64, scratch_operands = 0 : i64, tpu.core_type = #tpu.core_type<tc>, window_params = [{transform_indices = @transform_0, window_bounds = array<i64: 1, 1, 18, 16, 12>}, {transform_indices = @transform_1, window_bounds = array<i64: 3, 12, 128>}, {transform_indices = @transform_2, window_bounds = array<i64: 1, 128>}, {transform_indices = @transform_3, window_bounds = array<i64: 1, 128>}, {transform_indices = @transform_4, window_bounds = array<i64: 1, 16, 16, 128>}]} {
    %cst = arith.constant 0.000000e+00 : f32
    %0 = vector.broadcast %cst : f32 to vector<256x128xf32>
    %c0 = arith.constant 0 : index
    %c0_0 = arith.constant 0 : index
    %c0_1 = arith.constant 0 : index
    %c0_2 = arith.constant 0 : index
    %c0_3 = arith.constant 0 : index
    %1 = vector.load %arg3[%c0, %c0_0, %c0_1, %c0_2, %c0_3] : memref<1x1x18x16x12xbf16, #tpu.memory_space<vmem>>, vector<1x1x16x16x12xbf16>
    %2 = vector.shape_cast %1 : vector<1x1x16x16x12xbf16> to vector<16x16x12xbf16>
    %3 = vector.shape_cast %2 : vector<16x16x12xbf16> to vector<256x12xbf16>
    %c0_4 = arith.constant 0 : index
    %c0_5 = arith.constant 0 : index
    %c0_6 = arith.constant 0 : index
    %4 = vector.load %arg4[%c0_4, %c0_5, %c0_6] : memref<3x12x128xbf16, #tpu.memory_space<vmem>>, vector<1x12x128xbf16>
    %5 = vector.shape_cast %4 : vector<1x12x128xbf16> to vector<12x128xbf16>
    %cst_7 = arith.constant dense<0.000000e+00> : vector<256x128xf32>
    %6 = tpu.matmul %3, %5, %cst_7 {dimension_numbers = #tpu.dot_dimension_numbers<[1], [0], [0], [1], [0, 0, 1, 1], [], []>} : vector<256x12xbf16>, vector<12x128xbf16>, vector<256x128xf32> -> vector<256x128xf32>
    %7 = arith.addf %0, %6 : vector<256x128xf32>
    %c0_8 = arith.constant 0 : index
    %c0_9 = arith.constant 0 : index
    %c1 = arith.constant 1 : index
    %c0_10 = arith.constant 0 : index
    %c0_11 = arith.constant 0 : index
    %8 = vector.load %arg3[%c0_8, %c0_9, %c1, %c0_10, %c0_11] : memref<1x1x18x16x12xbf16, #tpu.memory_space<vmem>>, vector<1x1x16x16x12xbf16>
    %9 = vector.shape_cast %8 : vector<1x1x16x16x12xbf16> to vector<16x16x12xbf16>
    %10 = vector.shape_cast %9 : vector<16x16x12xbf16> to vector<256x12xbf16>
    %c1_12 = arith.constant 1 : index
    %c0_13 = arith.constant 0 : index
    %c0_14 = arith.constant 0 : index
    %11 = vector.load %arg4[%c1_12, %c0_13, %c0_14] : memref<3x12x128xbf16, #tpu.memory_space<vmem>>, vector<1x12x128xbf16>
    %12 = vector.shape_cast %11 : vector<1x12x128xbf16> to vector<12x128xbf16>
    %cst_15 = arith.constant dense<0.000000e+00> : vector<256x128xf32>
    %13 = tpu.matmul %10, %12, %cst_15 {dimension_numbers = #tpu.dot_dimension_numbers<[1], [0], [0], [1], [0, 0, 1, 1], [], []>} : vector<256x12xbf16>, vector<12x128xbf16>, vector<256x128xf32> -> vector<256x128xf32>
    %14 = arith.addf %7, %13 : vector<256x128xf32>
    %c0_16 = arith.constant 0 : index
    %c0_17 = arith.constant 0 : index
    %c2 = arith.constant 2 : index
    %c0_18 = arith.constant 0 : index
    %c0_19 = arith.constant 0 : index
    %15 = vector.load %arg3[%c0_16, %c0_17, %c2, %c0_18, %c0_19] : memref<1x1x18x16x12xbf16, #tpu.memory_space<vmem>>, vector<1x1x16x16x12xbf16>
    %16 = vector.shape_cast %15 : vector<1x1x16x16x12xbf16> to vector<16x16x12xbf16>
    %17 = vector.shape_cast %16 : vector<16x16x12xbf16> to vector<256x12xbf16>
    %c2_20 = arith.constant 2 : index
    %c0_21 = arith.constant 0 : index
    %c0_22 = arith.constant 0 : index
    %18 = vector.load %arg4[%c2_20, %c0_21, %c0_22] : memref<3x12x128xbf16, #tpu.memory_space<vmem>>, vector<1x12x128xbf16>
    %19 = vector.shape_cast %18 : vector<1x12x128xbf16> to vector<12x128xbf16>
    %cst_23 = arith.constant dense<0.000000e+00> : vector<256x128xf32>
    %20 = tpu.matmul %17, %19, %cst_23 {dimension_numbers = #tpu.dot_dimension_numbers<[1], [0], [0], [1], [0, 0, 1, 1], [], []>} : vector<256x12xbf16>, vector<12x128xbf16>, vector<256x128xf32> -> vector<256x128xf32>
    %21 = arith.addf %14, %20 : vector<256x128xf32>
    %c0_24 = arith.constant 0 : index
    %c0_25 = arith.constant 0 : index
    %22 = vector.load %arg5[%c0_24, %c0_25] : memref<1x128xf32, #tpu.memory_space<vmem>>, vector<1x128xf32>
    %23 = vector.broadcast %22 : vector<1x128xf32> to vector<256x128xf32>
    %24 = arith.mulf %21, %23 : vector<256x128xf32>
    %c0_26 = arith.constant 0 : index
    %c0_27 = arith.constant 0 : index
    %25 = vector.load %arg6[%c0_26, %c0_27] : memref<1x128xf32, #tpu.memory_space<vmem>>, vector<1x128xf32>
    %26 = vector.broadcast %25 : vector<1x128xf32> to vector<256x128xf32>
    %27 = arith.addf %24, %26 : vector<256x128xf32>
    %cst_28 = arith.constant 0.000000e+00 : f32
    %28 = vector.broadcast %cst_28 : f32 to vector<256x128xf32>
    %29 = arith.cmpf ogt, %27, %28 : vector<256x128xf32>
    %cst_29 = arith.constant 1.000000e-01 : f32
    %30 = vector.broadcast %cst_29 : f32 to vector<256x128xf32>
    %31 = arith.mulf %30, %27 : vector<256x128xf32>
    %32 = arith.select %29, %27, %31 : vector<256x128xi1>, vector<256x128xf32>
    %33 = vector.shape_cast %32 : vector<256x128xf32> to vector<16x16x128xf32>
    %c0_30 = arith.constant 0 : index
    %c0_31 = arith.constant 0 : index
    %c0_32 = arith.constant 0 : index
    %c0_33 = arith.constant 0 : index
    %34 = vector.load %arg7[%c0_30, %c0_31, %c0_32, %c0_33] : memref<1x16x16x128xf32, #tpu.memory_space<vmem>>, vector<1x16x16x128xf32>
    %35 = vector.shape_cast %34 : vector<1x16x16x128xf32> to vector<16x16x128xf32>
    %36 = vector.shape_cast %33 : vector<16x16x128xf32> to vector<1x16x16x128xf32>
    tpu.vector_store %arg7[%c0_30, %c0_31, %c0_32, %c0_33], %36 {strides = array<i32>} : memref<1x16x16x128xf32, #tpu.memory_space<vmem>>, vector<1x16x16x128xf32>,
    return
  }
  func.func @transform_0(%arg0: i32, %arg1: i32, %arg2: i32) -> (i32, i32, i32, i32, i32) {
    %c0_i32 = arith.constant 0 : i32
    %c0_i32_0 = arith.constant 0 : i32
    %c0_i32_1 = arith.constant 0 : i32
    %c0_i32_2 = arith.constant 0 : i32
    return %arg0, %arg1, %c0_i32, %c0_i32_0, %c0_i32_1 : i32, i32, i32, i32, i32
  }
  func.func @transform_1(%arg0: i32, %arg1: i32, %arg2: i32) -> (i32, i32, i32) {
    %c0_i32 = arith.constant 0 : i32
    %c0_i32_0 = arith.constant 0 : i32
    %c0_i32_1 = arith.constant 0 : i32
    return %c0_i32, %c0_i32_0, %arg2 : i32, i32, i32
  }
  func.func @transform_2(%arg0: i32, %arg1: i32, %arg2: i32) -> (i32, i32) {
    %c0_i32 = arith.constant 0 : i32
    %c0_i32_0 = arith.constant 0 : i32
    return %c0_i32, %arg2 : i32, i32
  }
  func.func @transform_3(%arg0: i32, %arg1: i32, %arg2: i32) -> (i32, i32) {
    %c0_i32 = arith.constant 0 : i32
    %c0_i32_0 = arith.constant 0 : i32
    return %c0_i32, %arg2 : i32, i32
  }
  func.func @transform_4(%arg0: i32, %arg1: i32, %arg2: i32) -> (i32, i32, i32, i32) {
    %c0_i32 = arith.constant 0 : i32
    %c0_i32_0 = arith.constant 0 : i32
    return %arg0, %arg1, %c0_i32, %arg2 : i32, i32, i32, i32
  }
}

</mosaic_0001>

<bundles_post_ra>
// kernel: tpu_custom_call.1
= control target key start
LH: loop header
LB: loop body
LE: loop exit
PB: predicated region body
PF: predicated region fallthrough
CT: control target
= control target key end

     0   :  { %9 = vsyncpa [#allocation3], 0  ;;  %s2651_s0 = inlined_call_operand.vmem [shape: bf16[2,1,18,16,12], index: 0, kind: input, shape index: {}]   ;;  %s2652_s1 = inlined_call_operand.vmem [shape: bf16[3,12,128], index: 1, kind: input, shape index: {}]   ;;  %s2653_s2 = inlined_call_operand.vmem [shape: f32[1,128], index: 2, kind: input, shape index: {}]   ;;  %s2654_s3 = inlined_call_operand.vmem [shape: f32[1,128], index: 3, kind: input, shape index: {}]   ;;  %s2655_s4 = inlined_call_operand.hbm [shape: f32[2,16,16,128], index: 4, kind: output, shape index: {}]  }
   0x1   :  { %11 = vsyncpa [#allocation3 + $0x1], 0  ;;  %s2285_s15 = smov 0   ;;  %s2287_s16 = smov 0  }
   0x2   :  { %s2289_s17 = smov 0   ;;  %s2291_s18 = smov 0  }
   0x3   :  { %s2293_s19 = smov 0   ;;  %s2295_s20 = smov 0  }
   0x4 LB: > { %s1660_s21 = sadd.s32 4294967295, %s2255_s20   ;;  %s1661_s22 = sadd.s32 4294967294, %s2255_s20   ;;  %s2255_s20 = sphi %s2295_s20, %s17_s20   ;;  %s2251_s19 = sphi %s2293_s19, %s2662_s19   ;;  %s2247_s18 = sphi %s2291_s18, %s2661_s18   ;;  %s2243_s17 = sphi %s2289_s17, %s2660_s17   ;;  %s2239_s16 = sphi %s2287_s16, %s2659_s16   ;;  %s2235_s15 = sphi %s2285_s15, %s2658_s15  }
   0x5   : > { %s36_s23 = sadd.s32 1, %s2251_s19  ;;  %s153_s24 = sadd.s32 1, %s2243_s17 }
   0x6   : > { %p38_p0 = scmp.ge.s32.totalorder %s36_s23, 2  ;;  %p163_p1 = scmp.ne.s32.totalorder %s2243_s17, %s2239_s16 }
   0x7   : > { %p164_p2 = scmp.eq.s32.totalorder %s1660_s21, 1  ;;  %p169_p3 = scmp.ne.s32.totalorder %s2239_s16, %s2235_s15 }
   0x8   : > { %s2664_s23 = smov (%p38_p0, %s36_s23), 0  ;;  %p170_p5 = scmp.eq.s32.totalorder %s1661_s22, 1 }
   0x9   : > { %p2325_p4 = por %p164_p2, %p163_p1  ;;  %s146_s26 = ssub.s32 %s2251_s19, %s2664_s23 }
   0xa   : > { %p1667_p6 = scmp.ge.s32.totalorder %s2255_s20, 1  ;;  %p151_p7 = scmp.eq.s32.totalorder %s146_s26, 0 }
   0xb   : > { %p2332_p8 = por %p170_p5, %p169_p3  ;;  %p219_p9 = scmp.lt.s32.totalorder %s2255_s20, 3 }
   0xc   : > { %s2338_s28 = scalar_select %p151_p7, %s2243_s17, %s153_s24  }
   0xd   : > { %p220_p10 = pnand %p1667_p6, %p219_p9 }
   0xe   : > { %v2126_v0 = vld [vmem:[%s2652_s1 + $0x8] sm:$0x3f] (!%p220_p10)   ;;  %vm484_vm0 = vcmask (!%p220_p10), 1045504   ;;  %p259_p11 = scmp.lt.s32.totalorder (!%p220_p10), %s2247_s18, 1  ;;  %v2127_v1 = vld [vmem:[%s2652_s1] sm:$0x3f] (!%p220_p10)  }
   0xf   : > { %223 = sbr.rel (%p220_p10) target bundleno = 356 (0x164), region = 36  ;;  %2064 = vmatprep.subr.msk.bf16.mxu1 (!%p220_p10), %vm484_vm0, %v2126_v0  ;;  %v486_v2 = vsel (!%p220_p10), %vm484_vm0, %v2126_v0, 0  ;;  %v2130_v3 = vld [vmem:[%s2652_s1 + $0x10] sm:$0x3f] (!%p220_p10)   ;;  %2065 = vmatprep.subr.msk.bf16.mxu0 (!%p220_p10), %vm484_vm0, %v2127_v1  ;;  %v783_v4 = vsel (!%p220_p10), %vm484_vm0, %v2127_v1, 0  ;;  %vm435_vm1 = vcmask (!%p220_p10), 97280  }
  0x10   : > { %1897 = vmatpush3.bf16.msra.mxu1 (!%p220_p10), %v486_v2  ;;  %1931 = vmatpush3.bf16.msra.mxu0 (!%p220_p10), %v783_v4  ;;  %v1116_v9 = vsel (!%p220_p10), %vm484_vm0, %v2130_v3, 0  ;;  %s256_s22 = sand.u32 (!%p220_p10), 1, %s2239_s16   ;;  %s1844_s5 = sshll.u32 (!%p220_p10), %s2247_s18, 12 }
  0x11   : > { %2066 = vmatprep.subr.msk.bf16.mxu1 (!%p220_p10), %vm484_vm0, %v2127_v1  ;;  %2067 = vmatprep.subr.msk.bf16.mxu0 (!%p220_p10), %vm484_vm0, %v2130_v3  ;;  %s1668_s29 = sshll.u32 (!%p220_p10), %s256_s22, 8  ;;  %s2605_s9 = scalar_lea.sflag (!%p220_p10), [#allocation3], %s256_s22 }
  0x12   : > { %s2496_s30 = scalar_lea.vmem (!%p220_p10), [#allocation2], %s1668_s29  ;;  %s2257_s11 = smov (!%p220_p10), [#allocation2]  }
  0x13   : > { %s1535_s6 = sshll.u32 (!%p220_p10), %s2496_s30, 4  ;;  %s2181_s12 = sshll.u32 (!%p220_p10), %s2257_s11, 4  ;;  %s2598_s6 = int_to_ptr.vmem [resolvable:$true] %s1535_s6  ;;  %s2182_s12 = int_to_ptr.vmem [resolvable:$false] %s2181_s12 }
  0x14   : > { %p2184_p1 = scmp.lt.s32.totalorder (!%p220_p10), %s2598_s6, %s2182_s12 }
  0x16   : > { %s260_s7 = scalar_select %p259_p11, %s2247_s18, 1 }
  0x17   : > { %s2596_s18 = scalar_lea.hbm %s2655_s4, %s1844_s5 }
  0x18   : > { %s2068_s10 = smul.u32 144, %s260_s7 }
  0x1a   : > { %s2360_s13 = scalar_lea.vmem %s2651_s0, %s2068_s10  ;;  %s2177_s10 = scalar_lea.vmem %s2598_s6, 4096 }
  0x1b   : > { %v2128_v5 = vld [vmem:[%s2360_s13 + $0x8] sm:$0xff]   ;;  %v2129_v6 = vld [vmem:[%s2360_s13] sm:$0xff]   ;;  %v2131_v7 = vld [vmem:[%s2360_s13 + $0x10] sm:$0xff]   ;;  %p2178_p12 = scmp.ne.s32.totalorder %s2598_s6, %s2177_s10 }
  0x1c   : > { %1898 = vmatprep.mubr.msk.bf16.mxu1 %vm435_vm1, %v2128_v5  ;;  %1932 = vmatprep.mubr.msk.bf16.mxu0 %vm435_vm1, %v2129_v6  ;;  %v2132_v8 = vld [vmem:[%s2360_s13 + $0x8] sm:$0xff]   ;;  %v2133_v10 = vld [vmem:[%s2360_s13 + $0x18] sm:$0xff]   ;;  %v2134_v11 = vld [vmem:[%s2360_s13 + $0x10] sm:$0xff]  }
  0x1d   : > { %1899 = vmatmul.mubr.msk.bf16.vlgmr.msra.gmra.mrb[0].mxu1 %vm435_vm1, %v2131_v7  ;;  %1933 = vmatmul.mubr.msk.bf16.vlgmr.msra.gmra.mrb[0].mxu0 %vm435_vm1, %v2132_v8  ;;  %v2135_v12 = vld [vmem:[%s2360_s13 + $0x20] sm:$0xff]   ;;  %v2136_v13 = vld [vmem:[%s2360_s13 + $0x18] sm:$0xff]   ;;  %v2137_v14 = vld [vmem:[%s2360_s13 + $0x28] sm:$0xff]   ;;  %p2179_p13 = pnand %p2178_p12, %p2325_p4 }
  0x1e   : > { %1999 = vmatpush3.bf16.msra.mxu1 %v783_v4  ;;  %1965 = vmatpush3.bf16.msra.mxu0 %v1116_v9  ;;  %v2138_v15 = vld [vmem:[%s2360_s13 + $0x20] sm:$0xff]   ;;  %v2139_v16 = vld [vmem:[%s2360_s13 + $0x30] sm:$0xff]   ;;  %v2140_v17 = vld [vmem:[%s2360_s13 + $0x28] sm:$0xff]  }
  0x1f   : > { %1902 = vmatprep.mubr.msk.bf16.mxu1 %vm435_vm1, %v2133_v10  ;;  %1936 = vmatprep.mubr.msk.bf16.mxu0 %vm435_vm1, %v2134_v11  ;;  %v2141_v18 = vld [vmem:[%s2360_s13 + $0x38] sm:$0xff]   ;;  %v2142_v19 = vld [vmem:[%s2360_s13 + $0x30] sm:$0xff]   ;;  %v2143_v20 = vld [vmem:[%s2360_s13 + $0x40] sm:$0xff]   ;;  %p2180_p0 = pneg %p2179_p13 }
  0x20   : > { %v2144_v21 = vld [vmem:[%s2360_s13 + $0x38] sm:$0xff]   ;;  %v2145_v22 = vld [vmem:[%s2360_s13 + $0x48] sm:$0xff]   ;;  %v2146_v23 = vld [vmem:[%s2360_s13 + $0x10] sm:$0xff]  }
  0x21   : > { %v2147_v24 = vld [vmem:[%s2360_s13 + $0x50] sm:$0xff]   ;;  %v2148_v25 = vld [vmem:[%s2360_s13 + $0x18] sm:$0xff]   ;;  %v2150_v27 = vld [vmem:[%s2360_s13 + $0x20] sm:$0xff]  }
  0x22   : > { %v2149_v26 = vld [vmem:[%s2360_s13 + $0x58] sm:$0xff]   ;;  %v2151_v28 = vld [vmem:[%s2360_s13 + $0x60] sm:$0xff]   ;;  %v2152_v29 = vld [vmem:[%s2360_s13 + $0x28] sm:$0xff]  }
  0x23   : > { %v2153_v30 = vld [vmem:[%s2360_s13 + $0x68] sm:$0xff]   ;;  %v2154_v31 = vld [vmem:[%s2360_s13 + $0x30] sm:$0xff]   ;;  %v2156_v33 = vld [vmem:[%s2360_s13 + $0x38] sm:$0xff]  }
  0x24   : > { %v2155_v32 = vld [vmem:[%s2360_s13 + $0x70] sm:$0xff]   ;;  %v2157_v34 = vld [vmem:[%s2360_s13 + $0x78] sm:$0xff]   ;;  %v2158_v35 = vld [vmem:[%s2360_s13 + $0x40] sm:$0xff]  }
  0x25   : > { %1903 = vmatmul.mubr.msk.bf16.gmra.mrb[4].mxu1 %vm435_vm1, %v2135_v12  ;;  %1937 = vmatmul.mubr.msk.bf16.gmra.mrb[4].mxu0 %vm435_vm1, %v2136_v13  ;;  %v2159_v36 = vld [vmem:[%s2360_s13 + $0x80] sm:$0xff]   ;;  %v2160_v37 = vld [vmem:[%s2360_s13 + $0x48] sm:$0xff]   ;;  %v2162_v39 = vld [vmem:[%s2360_s13 + $0x50] sm:$0xff]  }
  0x26   : > { %1906 = vmatprep.mubr.msk.bf16.mxu1 %vm435_vm1, %v2137_v14  ;;  %1940 = vmatprep.mubr.msk.bf16.mxu0 %vm435_vm1, %v2138_v15  ;;  %v2161_v38 = vld [vmem:[%s2360_s13 + $0x40] sm:$0xff]   ;;  %v2163_v40 = vld [vmem:[%s2360_s13 + $0x48] sm:$0xff]   ;;  %v2164_v41 = vld [vmem:[%s2360_s13 + $0x58] sm:$0xff]  }
  0x27   : > { %v2165_v42 = vld [vmem:[%s2360_s13 + $0x50] sm:$0xff]   ;;  %v2166_v43 = vld [vmem:[%s2360_s13 + $0x60] sm:$0xff]   ;;  %v2167_v44 = vld [vmem:[%s2360_s13 + $0x58] sm:$0xff]  }
  0x28   : > { %v2168_v45 = vld [vmem:[%s2360_s13 + $0x68] sm:$0xff]   ;;  %v2169_v46 = vld [vmem:[%s2360_s13 + $0x60] sm:$0xff]   ;;  %v2170_v47 = vld [vmem:[%s2360_s13 + $0x70] sm:$0xff]  }
  0x29   : > { %v2171_v48 = vld [vmem:[%s2360_s13 + $0x68] sm:$0xff]   ;;  %v2172_v49 = vld [vmem:[%s2360_s13 + $0x78] sm:$0xff]   ;;  %v2173_v50 = vld [vmem:[%s2360_s13 + $0x70] sm:$0xff]  }
  0x2a   : > { %v2174_v51 = vld [vmem:[%s2360_s13 + $0x80] sm:$0xff]   ;;  %v2175_v52 = vld [vmem:[%s2360_s13 + $0x78] sm:$0xff]   ;;  %v2176_v53 = vld [vmem:[%s2360_s13 + $0x88] sm:$0xff]   ;;  %s2183_s13 = scalar_lea.vmem %s2182_s12, 8192 }
  0x2b   : > { %v2478_v7 = vld [vmem:[%s2653_s2] ss:$0 sm:$0xff]  ;;  %p2185_p2 = scmp.lt.s32.totalorder %s2183_s13, %s2177_s10 }
  0x2c   : > { %v2484_v10 = vld [vmem:[%s2654_s3] ss:$0 sm:$0xff] }
  0x2d   : > { %1907 = vmatmul.mubr.msk.bf16.gmra.mrb[8].mxu1 %vm435_vm1, %v2139_v16  ;;  %1941 = vmatmul.mubr.msk.bf16.gmra.mrb[8].mxu0 %vm435_vm1, %v2140_v17  ;;  %p2186_p3 = por %p2185_p2, %p2184_p1 }
  0x2e   : > { %1910 = vmatprep.mubr.msk.bf16.mxu1 %vm435_vm1, %v2141_v18  ;;  %1944 = vmatprep.mubr.msk.bf16.mxu0 %vm435_vm1, %v2142_v19 }
  0x2f   : > { %p2187_p5 = pnand %p2186_p3, %p2180_p0 }
  0x35   : > { %1911 = vmatmul.mubr.msk.bf16.gmra.mrb[12].mxu1 %vm435_vm1, %v2143_v20  ;;  %1945 = vmatmul.mubr.msk.bf16.gmra.mrb[12].mxu0 %vm435_vm1, %v2144_v21 }
  0x36   : > { %1914 = vmatprep.mubr.msk.bf16.mxu1 %vm435_vm1, %v2145_v22  ;;  %1966 = vmatprep.mubr.msk.bf16.mxu0 %vm435_vm1, %v2146_v23 }
  0x3d   : > { %1915 = vmatmul.mubr.msk.bf16.gmra.mrb[16].mxu1 %vm435_vm1, %v2147_v24  ;;  %1967 = vmatmul.mubr.msk.bf16.vlgmr.msra.gmra.mrb[0].mxu0 %vm435_vm1, %v2148_v25 }
  0x3e   : > { %1918 = vmatprep.mubr.msk.bf16.mxu1 %vm435_vm1, %v2149_v26  ;;  %1970 = vmatprep.mubr.msk.bf16.mxu0 %vm435_vm1, %v2150_v27 }
  0x45   : > { %1919 = vmatmul.mubr.msk.bf16.gmra.mrb[20].mxu1 %vm435_vm1, %v2151_v28  ;;  %1971 = vmatmul.mubr.msk.bf16.gmra.mrb[4].mxu0 %vm435_vm1, %v2152_v29 }
  0x46   : > { %1922 = vmatprep.mubr.msk.bf16.mxu1 %vm435_vm1, %v2153_v30  ;;  %1974 = vmatprep.mubr.msk.bf16.mxu0 %vm435_vm1, %v2154_v31 }
  0x4d   : > { %1923 = vmatmul.mubr.msk.bf16.gmra.mrb[24].mxu1 %vm435_vm1, %v2155_v32  ;;  %1975 = vmatmul.mubr.msk.bf16.gmra.mrb[8].mxu0 %vm435_vm1, %v2156_v33 }
  0x4e   : > { %1926 = vmatprep.mubr.msk.bf16.mxu1 %vm435_vm1, %v2157_v34  ;;  %1978 = vmatprep.mubr.msk.bf16.mxu0 %vm435_vm1, %v2158_v35 }
  0x55   : > { %1927 = vmatmul.mubr.msk.bf16.gmra.mrb[28].mxu1 %vm435_vm1, %v2159_v36  ;;  %1979 = vmatmul.mubr.msk.bf16.gmra.mrb[12].mxu0 %vm435_vm1, %v2160_v37 }
  0x56   : > { %1948 = vmatprep.mubr.msk.bf16.mxu1 %vm435_vm1, %v2161_v38  ;;  %1982 = vmatprep.mubr.msk.bf16.mxu0 %vm435_vm1, %v2162_v39 }
  0x5d   : > { %1949 = vmatmul.mubr.msk.bf16.vlgmr.msra.gmra.mrb[16].mxu1 %vm435_vm1, %v2163_v40  ;;  %1983 = vmatmul.mubr.msk.bf16.gmra.mrb[16].mxu0 %vm435_vm1, %v2164_v41 }
  0x5e   : > { %1952 = vmatprep.mubr.msk.bf16.mxu1 %vm435_vm1, %v2165_v42  ;;  %1986 = vmatprep.mubr.msk.bf16.mxu0 %vm435_vm1, %v2166_v43 }
  0x65   : > { %1953 = vmatmul.mubr.msk.bf16.gmra.mrb[20].mxu1 %vm435_vm1, %v2167_v44  ;;  %1987 = vmatmul.mubr.msk.bf16.gmra.mrb[20].mxu0 %vm435_vm1, %v2168_v45 }
  0x66   : > { %1956 = vmatprep.mubr.msk.bf16.mxu1 %vm435_vm1, %v2169_v46  ;;  %1990 = vmatprep.mubr.msk.bf16.mxu0 %vm435_vm1, %v2170_v47 }
  0x6d   : > { %1957 = vmatmul.mubr.msk.bf16.gmra.mrb[24].mxu1 %vm435_vm1, %v2171_v48  ;;  %1991 = vmatmul.mubr.msk.bf16.gmra.mrb[24].mxu0 %vm435_vm1, %v2172_v49 }
  0x6e   : > { %1960 = vmatprep.mubr.msk.bf16.mxu1 %vm435_vm1, %v2173_v50  ;;  %1994 = vmatprep.mubr.msk.bf16.mxu0 %vm435_vm1, %v2174_v51 }
  0x75   : > { %1961 = vmatmul.mubr.msk.bf16.gmra.mrb[28].mxu1 %vm435_vm1, %v2175_v52  ;;  %1995 = vmatmul.mubr.msk.bf16.gmra.mrb[28].mxu0 %vm435_vm1, %v2176_v53 }
  0xf0   : > { %v1900_v54 = vpop.f32.mrb[0].mxu1 }
  0xf1   : > { %v522_v55 = vpop.f32.mrb[1].mxu1 }
  0xf2   : > { %v1901_v56 = vpop.f32.mrb[2].mxu1 }
  0xf3   : > { %v525_v57 = vpop.f32.mrb[3].mxu1 }
  0xf8   : > { %v1904_v58 = vpop.f32.mrb[4].mxu1 }
  0xf9   : > { %v538_v59 = vpop.f32.mrb[5].mxu1 }
  0xfa   : > { %v1905_v60 = vpop.f32.mrb[6].mxu1 }
  0xfb   : > { %v541_v61 = vpop.f32.mrb[7].mxu1 }
 0x100   : > { %v2459_v62 = vpop.f32.mrb[8].mxu1 }
 0x101   : > { %v2461_v63 = vpop.f32.mrb[9].mxu1 }
 0x102   : > { %v2463_v0 = vpop.f32.mrb[10].mxu1 }
 0x103   : > { %v2465_v1 = vpop.f32.mrb[11].mxu1 }
 0x108   : > { %v2467_v2 = vpop.f32.mrb[12].mxu1 }
 0x109   : > { %v2469_v3 = vpop.f32.mrb[13].mxu1 }
 0x10a   : > { %v2471_v4 = vpop.f32.mrb[14].mxu1 }
 0x10b   : > { %v2473_v5 = vpop.f32.mrb[15].mxu1 }
 0x110   : > { %v1968_v6 = vpop.f32.mrb[0].mxu0 }
 0x111   : > { %v2000_v8 = vadd.f32 %v1968_v6, %v1900_v54  ;;  %v1152_v9 = vpop.f32.mrb[1].mxu0 }
 0x112   : > { %v2001_v11 = vadd.f32 %v1152_v9, %v522_v55  ;;  %v1969_v12 = vpop.f32.mrb[2].mxu0 }
 0x113   : > { %v1320_v13 = vmul.f32 %v2000_v8, %v2478_v7  ;;  %v2002_v14 = vadd.f32 %v1969_v12, %v1901_v56  ;;  %v1155_v15 = vpop.f32.mrb[3].mxu0 }
 0x114   : > { %v1318_v16 = vmul.f32 %v2001_v11, %v2478_v7  ;;  %v2003_v17 = vadd.f32 %v1155_v15, %v525_v57 }
 0x115   : > { %v1359_v18 = vadd.f32 %v2484_v10, %v1320_v13  ;;  %v1321_v19 = vmul.f32 %v2002_v14, %v2478_v7 }
 0x116   : > { %v1357_v20 = vadd.f32 %v2484_v10, %v1318_v16  ;;  %v1319_v21 = vmul.f32 %v2003_v17, %v2478_v7 }
 0x117   : > { %vm1391_vm2 = vcmp.gt.f32.partialorder %v1359_v18, 0.0  ;;  %v1423_v22 = vmul.f32 0.1, %v1359_v18  ;;  %v1360_v23 = vadd.f32 %v2484_v10, %v1321_v19 }
 0x118   : > { %vm1389_vm3 = vcmp.gt.f32.partialorder %v1357_v20, 0.0  ;;  %v1421_v24 = vmul.f32 0.1, %v1357_v20  ;;  %v1358_v25 = vadd.f32 %v2484_v10, %v1319_v21  ;;  %v1972_v26 = vpop.f32.mrb[4].mxu0 }
 0x119   : > { %v1455_v27 = vsel %vm1391_vm2, %v1359_v18, %v1423_v22  ;;  %vm1392_vm4 = vcmp.gt.f32.partialorder %v1360_v23, 0.0  ;;  %v1424_v28 = vmul.f32 0.1, %v1360_v23  ;;  %v2004_v29 = vadd.f32 %v1972_v26, %v1904_v58  ;;  %v1168_v30 = vpop.f32.mrb[5].mxu0 }
 0x11a   : > { %1487 = vst [vmem:[%s2496_s30 + $0x10] sm:$0xff] %v1455_v27  ;;  %v1453_v31 = vsel %vm1389_vm3, %v1357_v20, %v1421_v24  ;;  %vm1390_vm5 = vcmp.gt.f32.partialorder %v1358_v25, 0.0  ;;  %v1422_v32 = vmul.f32 0.1, %v1358_v25  ;;  %v2005_v33 = vadd.f32 %v1168_v30, %v538_v59  ;;  %v1973_v34 = vpop.f32.mrb[6].mxu0 }
 0x11b   : > { %1485 = vst [vmem:[%s2496_s30] sm:$0xff] %v1453_v31  ;;  %v1456_v35 = vsel %vm1392_vm4, %v1360_v23, %v1424_v28  ;;  %v1324_v36 = vmul.f32 %v2004_v29, %v2478_v7  ;;  %v2006_v37 = vadd.f32 %v1973_v34, %v1905_v60  ;;  %v1171_v38 = vpop.f32.mrb[7].mxu0 }
 0x11c   : > { %1488 = vst [vmem:[%s2496_s30 + $0x18] sm:$0xff] %v1456_v35  ;;  %v1454_v39 = vsel %vm1390_vm5, %v1358_v25, %v1422_v32  ;;  %v1322_v40 = vmul.f32 %v2005_v33, %v2478_v7  ;;  %v2007_v41 = vadd.f32 %v1171_v38, %v541_v61 }
 0x11d   : > { %1486 = vst [vmem:[%s2496_s30 + $0x8] sm:$0xff] %v1454_v39  ;;  %v1363_v42 = vadd.f32 %v2484_v10, %v1324_v36  ;;  %v1325_v43 = vmul.f32 %v2006_v37, %v2478_v7 }
 0x11e   : > { %v1361_v44 = vadd.f32 %v2484_v10, %v1322_v40  ;;  %v1323_v45 = vmul.f32 %v2007_v41, %v2478_v7 }
 0x11f   : > { %vm1395_vm6 = vcmp.gt.f32.partialorder %v1363_v42, 0.0  ;;  %v1427_v46 = vmul.f32 0.1, %v1363_v42  ;;  %v1364_v47 = vadd.f32 %v2484_v10, %v1325_v43 }
 0x120   : > { %vm1393_vm7 = vcmp.gt.f32.partialorder %v1361_v44, 0.0  ;;  %v1425_v48 = vmul.f32 0.1, %v1361_v44  ;;  %v1362_v49 = vadd.f32 %v2484_v10, %v1323_v45  ;;  %v1976_v50 = vpop.f32.mrb[8].mxu0 }
 0x121   : > { %v1459_v51 = vsel %vm1395_vm6, %v1363_v42, %v1427_v46  ;;  %vm1396_vm8 = vcmp.gt.f32.partialorder %v1364_v47, 0.0  ;;  %v1428_v52 = vmul.f32 0.1, %v1364_v47  ;;  %v2008_v53 = vadd.f32 %v1976_v50, %v2459_v62  ;;  %v1184_v54 = vpop.f32.mrb[9].mxu0 }
 0x122   : > { %1491 = vst [vmem:[%s2496_s30 + $0x30] sm:$0xff] %v1459_v51  ;;  %v1457_v55 = vsel %vm1393_vm7, %v1361_v44, %v1425_v48  ;;  %vm1394_vm9 = vcmp.gt.f32.partialorder %v1362_v49, 0.0  ;;  %v1426_v56 = vmul.f32 0.1, %v1362_v49  ;;  %v2009_v57 = vadd.f32 %v1184_v54, %v2461_v63  ;;  %v1977_v58 = vpop.f32.mrb[10].mxu0 }
 0x123   : > { %1489 = vst [vmem:[%s2496_s30 + $0x20] sm:$0xff] %v1457_v55  ;;  %v1460_v59 = vsel %vm1396_vm8, %v1364_v47, %v1428_v52  ;;  %v1328_v60 = vmul.f32 %v2008_v53, %v2478_v7  ;;  %v2010_v61 = vadd.f32 %v1977_v58, %v2463_v0  ;;  %v1187_v6 = vpop.f32.mrb[11].mxu0 }
 0x124   : > { %1492 = vst [vmem:[%s2496_s30 + $0x38] sm:$0xff] %v1460_v59  ;;  %v1458_v8 = vsel %vm1394_vm9, %v1362_v49, %v1426_v56  ;;  %v1326_v62 = vmul.f32 %v2009_v57, %v2478_v7  ;;  %v2011_v9 = vadd.f32 %v1187_v6, %v2465_v1 }
 0x125   : > { %1490 = vst [vmem:[%s2496_s30 + $0x28] sm:$0xff] %v1458_v8  ;;  %v1367_v11 = vadd.f32 %v2484_v10, %v1328_v60  ;;  %v1329_v63 = vmul.f32 %v2010_v61, %v2478_v7 }
 0x126   : > { %v1365_v12 = vadd.f32 %v2484_v10, %v1326_v62  ;;  %v1327_v13 = vmul.f32 %v2011_v9, %v2478_v7 }
 0x127   : > { %vm1399_vm10 = vcmp.gt.f32.partialorder %v1367_v11, 0.0  ;;  %v1431_v14 = vmul.f32 0.1, %v1367_v11  ;;  %v1368_v0 = vadd.f32 %v2484_v10, %v1329_v63 }
 0x128   : > { %vm1397_vm11 = vcmp.gt.f32.partialorder %v1365_v12, 0.0  ;;  %v1429_v15 = vmul.f32 0.1, %v1365_v12  ;;  %v1366_v16 = vadd.f32 %v2484_v10, %v1327_v13  ;;  %v1980_v1 = vpop.f32.mrb[12].mxu0 }
 0x129   : > { %v1463_v17 = vsel %vm1399_vm10, %v1367_v11, %v1431_v14  ;;  %vm1400_vm12 = vcmp.gt.f32.partialorder %v1368_v0, 0.0  ;;  %v1432_v18 = vmul.f32 0.1, %v1368_v0  ;;  %v2012_v19 = vadd.f32 %v1980_v1, %v2467_v2  ;;  %v1200_v20 = vpop.f32.mrb[13].mxu0 }
 0x12a   : > { %1495 = vst [vmem:[%s2496_s30 + $0x50] sm:$0xff] %v1463_v17  ;;  %v1461_v21 = vsel %vm1397_vm11, %v1365_v12, %v1429_v15  ;;  %vm1398_vm13 = vcmp.gt.f32.partialorder %v1366_v16, 0.0  ;;  %v1430_v22 = vmul.f32 0.1, %v1366_v16  ;;  %v2013_v23 = vadd.f32 %v1200_v20, %v2469_v3  ;;  %v1981_v24 = vpop.f32.mrb[14].mxu0 }
 0x12b   : > { %1493 = vst [vmem:[%s2496_s30 + $0x40] sm:$0xff] %v1461_v21  ;;  %v1464_v25 = vsel %vm1400_vm12, %v1368_v0, %v1432_v18  ;;  %v1332_v26 = vmul.f32 %v2012_v19, %v2478_v7  ;;  %v2014_v27 = vadd.f32 %v1981_v24, %v2471_v4  ;;  %v1203_v28 = vpop.f32.mrb[15].mxu0 }
 0x12c   : > { %1496 = vst [vmem:[%s2496_s30 + $0x58] sm:$0xff] %v1464_v25  ;;  %v1462_v29 = vsel %vm1398_vm13, %v1366_v16, %v1430_v22  ;;  %v1330_v2 = vmul.f32 %v2013_v23, %v2478_v7  ;;  %v2015_v30 = vadd.f32 %v1203_v28, %v2473_v5 }
 0x12d   : > { %1494 = vst [vmem:[%s2496_s30 + $0x48] sm:$0xff] %v1462_v29  ;;  %v1371_v31 = vadd.f32 %v2484_v10, %v1332_v26  ;;  %v1333_v32 = vmul.f32 %v2014_v27, %v2478_v7 }
 0x12e   : > { %v1369_v3 = vadd.f32 %v2484_v10, %v1330_v2  ;;  %v1331_v33 = vmul.f32 %v2015_v30, %v2478_v7 }
 0x12f   : > { %vm1403_vm14 = vcmp.gt.f32.partialorder %v1371_v31, 0.0  ;;  %v1435_v34 = vmul.f32 0.1, %v1371_v31  ;;  %v1372_v4 = vadd.f32 %v2484_v10, %v1333_v32 }
 0x130   : > { %v1950_v35 = vpop.f32.mrb[16].mxu1  ;;  %vm1401_vm15 = vcmp.gt.f32.partialorder %v1369_v3, 0.0  ;;  %v1433_v36 = vmul.f32 0.1, %v1369_v3  ;;  %v1370_v37 = vadd.f32 %v2484_v10, %v1331_v33  ;;  %v1984_v5 = vpop.f32.mrb[16].mxu0 }
 0x131   : > { %v883_v38 = vpop.f32.mrb[17].mxu1  ;;  %v1467_v39 = vsel %vm1403_vm14, %v1371_v31, %v1435_v34  ;;  %vm1404_vm0 = vcmp.gt.f32.partialorder %v1372_v4, 0.0  ;;  %v1436_v40 = vmul.f32 0.1, %v1372_v4  ;;  %v2016_v41 = vadd.f32 %v1984_v5, %v1950_v35  ;;  %v1216_v42 = vpop.f32.mrb[17].mxu0 }
 0x132   : > { %v1951_v43 = vpop.f32.mrb[18].mxu1  ;;  %1499 = vst [vmem:[%s2496_s30 + $0x70] sm:$0xff] %v1467_v39  ;;  %v1465_v44 = vsel %vm1401_vm15, %v1369_v3, %v1433_v36  ;;  %vm1402_vm1 = vcmp.gt.f32.partialorder %v1370_v37, 0.0  ;;  %v1434_v45 = vmul.f32 0.1, %v1370_v37  ;;  %v2017_v46 = vadd.f32 %v1216_v42, %v883_v38  ;;  %v1985_v47 = vpop.f32.mrb[18].mxu0 }
 0x133   : > { %v886_v48 = vpop.f32.mrb[19].mxu1  ;;  %1497 = vst [vmem:[%s2496_s30 + $0x60] sm:$0xff] %v1465_v44  ;;  %v1468_v49 = vsel %vm1404_vm0, %v1372_v4, %v1436_v40  ;;  %v1336_v50 = vmul.f32 %v2016_v41, %v2478_v7  ;;  %v2018_v51 = vadd.f32 %v1985_v47, %v1951_v43  ;;  %v1219_v52 = vpop.f32.mrb[19].mxu0 }
 0x134   : > { %1500 = vst [vmem:[%s2496_s30 + $0x78] sm:$0xff] %v1468_v49  ;;  %v1466_v53 = vsel %vm1402_vm1, %v1370_v37, %v1434_v45  ;;  %v1334_v54 = vmul.f32 %v2017_v46, %v2478_v7  ;;  %v2019_v55 = vadd.f32 %v1219_v52, %v886_v48 }
 0x135   : > { %1498 = vst [vmem:[%s2496_s30 + $0x68] sm:$0xff] %v1466_v53  ;;  %v1375_v56 = vadd.f32 %v2484_v10, %v1336_v50  ;;  %v1337_v57 = vmul.f32 %v2018_v51, %v2478_v7 }
 0x136   : > { %v1373_v58 = vadd.f32 %v2484_v10, %v1334_v54  ;;  %v1335_v59 = vmul.f32 %v2019_v55, %v2478_v7 }
 0x137   : > { %vm1407_vm2 = vcmp.gt.f32.partialorder %v1375_v56, 0.0  ;;  %v1439_v60 = vmul.f32 0.1, %v1375_v56  ;;  %v1376_v61 = vadd.f32 %v2484_v10, %v1337_v57 }
 0x138   : > { %v1954_v6 = vpop.f32.mrb[20].mxu1  ;;  %vm1405_vm3 = vcmp.gt.f32.partialorder %v1373_v58, 0.0  ;;  %v1437_v8 = vmul.f32 0.1, %v1373_v58  ;;  %v1374_v62 = vadd.f32 %v2484_v10, %v1335_v59  ;;  %v1988_v9 = vpop.f32.mrb[20].mxu0 }
 0x139   : > { %v899_v11 = vpop.f32.mrb[21].mxu1  ;;  %v1471_v63 = vsel %vm1407_vm2, %v1375_v56, %v1439_v60  ;;  %vm1408_vm4 = vcmp.gt.f32.partialorder %v1376_v61, 0.0  ;;  %v1440_v12 = vmul.f32 0.1, %v1376_v61  ;;  %v2020_v13 = vadd.f32 %v1988_v9, %v1954_v6  ;;  %v1232_v14 = vpop.f32.mrb[21].mxu0 }
 0x13a   : > { %v1955_v0 = vpop.f32.mrb[22].mxu1  ;;  %1503 = vst [vmem:[%s2496_s30 + $0x90] sm:$0xff] %v1471_v63  ;;  %v1469_v15 = vsel %vm1405_vm3, %v1373_v58, %v1437_v8  ;;  %vm1406_vm5 = vcmp.gt.f32.partialorder %v1374_v62, 0.0  ;;  %v1438_v16 = vmul.f32 0.1, %v1374_v62  ;;  %v2021_v1 = vadd.f32 %v1232_v14, %v899_v11  ;;  %v1989_v17 = vpop.f32.mrb[22].mxu0 }
 0x13b   : > { %v902_v18 = vpop.f32.mrb[23].mxu1  ;;  %1501 = vst [vmem:[%s2496_s30 + $0x80] sm:$0xff] %v1469_v15  ;;  %v1472_v19 = vsel %vm1408_vm4, %v1376_v61, %v1440_v12  ;;  %v1340_v20 = vmul.f32 %v2020_v13, %v2478_v7  ;;  %v2022_v21 = vadd.f32 %v1989_v17, %v1955_v0  ;;  %v1235_v22 = vpop.f32.mrb[23].mxu0 }
 0x13c   : > { %1504 = vst [vmem:[%s2496_s30 + $0x98] sm:$0xff] %v1472_v19  ;;  %v1470_v23 = vsel %vm1406_vm5, %v1374_v62, %v1438_v16  ;;  %v1338_v24 = vmul.f32 %v2021_v1, %v2478_v7  ;;  %v2023_v25 = vadd.f32 %v1235_v22, %v902_v18 }
 0x13d   : > { %1502 = vst [vmem:[%s2496_s30 + $0x88] sm:$0xff] %v1470_v23  ;;  %v1379_v26 = vadd.f32 %v2484_v10, %v1340_v20  ;;  %v1341_v27 = vmul.f32 %v2022_v21, %v2478_v7 }
 0x13e   : > { %v1377_v28 = vadd.f32 %v2484_v10, %v1338_v24  ;;  %v1339_v29 = vmul.f32 %v2023_v25, %v2478_v7 }
 0x13f   : > { %vm1411_vm6 = vcmp.gt.f32.partialorder %v1379_v26, 0.0  ;;  %v1443_v2 = vmul.f32 0.1, %v1379_v26  ;;  %v1380_v30 = vadd.f32 %v2484_v10, %v1341_v27 }
 0x140   : > { %v1958_v31 = vpop.f32.mrb[24].mxu1  ;;  %vm1409_vm7 = vcmp.gt.f32.partialorder %v1377_v28, 0.0  ;;  %v1441_v32 = vmul.f32 0.1, %v1377_v28  ;;  %v1378_v3 = vadd.f32 %v2484_v10, %v1339_v29  ;;  %v1992_v33 = vpop.f32.mrb[24].mxu0 }
 0x141   : > { %v915_v34 = vpop.f32.mrb[25].mxu1  ;;  %v1475_v4 = vsel %vm1411_vm6, %v1379_v26, %v1443_v2  ;;  %vm1412_vm8 = vcmp.gt.f32.partialorder %v1380_v30, 0.0  ;;  %v1444_v35 = vmul.f32 0.1, %v1380_v30  ;;  %v2024_v36 = vadd.f32 %v1992_v33, %v1958_v31  ;;  %v1248_v37 = vpop.f32.mrb[25].mxu0 }
 0x142   : > { %v1959_v5 = vpop.f32.mrb[26].mxu1  ;;  %1507 = vst [vmem:[%s2496_s30 + $0xb0] sm:$0xff] %v1475_v4  ;;  %v1473_v38 = vsel %vm1409_vm7, %v1377_v28, %v1441_v32  ;;  %vm1410_vm9 = vcmp.gt.f32.partialorder %v1378_v3, 0.0  ;;  %v1442_v39 = vmul.f32 0.1, %v1378_v3  ;;  %v2025_v40 = vadd.f32 %v1248_v37, %v915_v34  ;;  %v1993_v41 = vpop.f32.mrb[26].mxu0 }
 0x143   : > { %v918_v42 = vpop.f32.mrb[27].mxu1  ;;  %1505 = vst [vmem:[%s2496_s30 + $0xa0] sm:$0xff] %v1473_v38  ;;  %v1476_v43 = vsel %vm1412_vm8, %v1380_v30, %v1444_v35  ;;  %v1344_v44 = vmul.f32 %v2024_v36, %v2478_v7  ;;  %v2026_v45 = vadd.f32 %v1993_v41, %v1959_v5  ;;  %v1251_v46 = vpop.f32.mrb[27].mxu0 }
 0x144   : > { %1508 = vst [vmem:[%s2496_s30 + $0xb8] sm:$0xff] %v1476_v43  ;;  %v1474_v47 = vsel %vm1410_vm9, %v1378_v3, %v1442_v39  ;;  %v1342_v48 = vmul.f32 %v2025_v40, %v2478_v7  ;;  %v2027_v49 = vadd.f32 %v1251_v46, %v918_v42 }
 0x145   : > { %1506 = vst [vmem:[%s2496_s30 + $0xa8] sm:$0xff] %v1474_v47  ;;  %v1383_v50 = vadd.f32 %v2484_v10, %v1344_v44  ;;  %v1345_v51 = vmul.f32 %v2026_v45, %v2478_v7 }
 0x146   : > { %v1381_v52 = vadd.f32 %v2484_v10, %v1342_v48  ;;  %v1343_v53 = vmul.f32 %v2027_v49, %v2478_v7 }
 0x147   : > { %vm1415_vm10 = vcmp.gt.f32.partialorder %v1383_v50, 0.0  ;;  %v1447_v54 = vmul.f32 0.1, %v1383_v50  ;;  %v1384_v55 = vadd.f32 %v2484_v10, %v1345_v51 }
 0x148   : > { %v1962_v56 = vpop.f32.mrb[28].mxu1  ;;  %vm1413_vm11 = vcmp.gt.f32.partialorder %v1381_v52, 0.0  ;;  %v1445_v57 = vmul.f32 0.1, %v1381_v52  ;;  %v1382_v58 = vadd.f32 %v2484_v10, %v1343_v53  ;;  %v1996_v59 = vpop.f32.mrb[28].mxu0 }
 0x149   : > { %v931_v60 = vpop.f32.mrb[29].mxu1  ;;  %v1479_v61 = vsel %vm1415_vm10, %v1383_v50, %v1447_v54  ;;  %vm1416_vm12 = vcmp.gt.f32.partialorder %v1384_v55, 0.0  ;;  %v1448_v6 = vmul.f32 0.1, %v1384_v55  ;;  %v2028_v8 = vadd.f32 %v1996_v59, %v1962_v56  ;;  %v1264_v62 = vpop.f32.mrb[29].mxu0 }
 0x14a   : > { %v1963_v9 = vpop.f32.mrb[30].mxu1  ;;  %1511 = vst [vmem:[%s2496_s30 + $0xd0] sm:$0xff] %v1479_v61  ;;  %v1477_v11 = vsel %vm1413_vm11, %v1381_v52, %v1445_v57  ;;  %vm1414_vm13 = vcmp.gt.f32.partialorder %v1382_v58, 0.0  ;;  %v1446_v63 = vmul.f32 0.1, %v1382_v58  ;;  %v2029_v12 = vadd.f32 %v1264_v62, %v931_v60  ;;  %v1997_v13 = vpop.f32.mrb[30].mxu0 }
 0x14b   : > { %v934_v14 = vpop.f32.mrb[31].mxu1  ;;  %1509 = vst [vmem:[%s2496_s30 + $0xc0] sm:$0xff] %v1477_v11  ;;  %v1480_v0 = vsel %vm1416_vm12, %v1384_v55, %v1448_v6  ;;  %v1348_v15 = vmul.f32 %v2028_v8, %v2478_v7  ;;  %v2030_v16 = vadd.f32 %v1997_v13, %v1963_v9  ;;  %v1267_v1 = vpop.f32.mrb[31].mxu0 }
 0x14c   : > { %1512 = vst [vmem:[%s2496_s30 + $0xd8] sm:$0xff] %v1480_v0  ;;  %v1478_v17 = vsel %vm1414_vm13, %v1382_v58, %v1446_v63  ;;  %v1346_v18 = vmul.f32 %v2029_v12, %v2478_v7  ;;  %v2031_v19 = vadd.f32 %v1267_v1, %v934_v14 }
 0x14d   : > { %1510 = vst [vmem:[%s2496_s30 + $0xc8] sm:$0xff] %v1478_v17  ;;  %v1387_v20 = vadd.f32 %v2484_v10, %v1348_v15  ;;  %v1349_v21 = vmul.f32 %v2030_v16, %v2478_v7 }
 0x14e   : > { %v1385_v22 = vadd.f32 %v2484_v10, %v1346_v18  ;;  %v1347_v23 = vmul.f32 %v2031_v19, %v2478_v7 }
 0x14f   : > { %vm1419_vm14 = vcmp.gt.f32.partialorder %v1387_v20, 0.0  ;;  %v1451_v24 = vmul.f32 0.1, %v1387_v20  ;;  %v1388_v25 = vadd.f32 %v2484_v10, %v1349_v21 }
 0x150   : > { %vm1417_vm15 = vcmp.gt.f32.partialorder %v1385_v22, 0.0  ;;  %v1449_v26 = vmul.f32 0.1, %v1385_v22  ;;  %v1386_v27 = vadd.f32 %v2484_v10, %v1347_v23 }
 0x151   : > { %v1483_v28 = vsel %vm1419_vm14, %v1387_v20, %v1451_v24  ;;  %vm1420_vm0 = vcmp.gt.f32.partialorder %v1388_v25, 0.0  ;;  %v1452_v29 = vmul.f32 0.1, %v1388_v25 }
 0x152   : > { %1515 = vst [vmem:[%s2496_s30 + $0xf0] sm:$0xff] %v1483_v28  ;;  %v1481_v7 = vsel %vm1417_vm15, %v1385_v22, %v1449_v26  ;;  %vm1418_vm1 = vcmp.gt.f32.partialorder %v1386_v27, 0.0  ;;  %v1450_v2 = vmul.f32 0.1, %v1386_v27 }
 0x153   : > { %1513 = vst [vmem:[%s2496_s30 + $0xe0] sm:$0xff] %v1481_v7  ;;  %v1484_v10 = vsel %vm1420_vm0, %v1388_v25, %v1452_v29 }
 0x154   : > { %1516 = vst [vmem:[%s2496_s30 + $0xf8] sm:$0xff] %v1484_v10  ;;  %v1482_v30 = vsel %vm1418_vm1, %v1386_v27, %v1450_v2 }
 0x155   : > { %1514 = vst [vmem:[%s2496_s30 + $0xe8] sm:$0xff] %v1482_v30 }
 0x156   : > { %2190 = shalt.err (!%p2187_p5)
}
 0x157   : > { %s2191_s14 = scalar_lea.hbm %s2596_s18, 4096  ;;  %s2195_s24 = scalar_lea.hbm %s2655_s4, 8192 }
 0x158   : > { %p2192_p6 = scmp.ne.s32.totalorder %s2596_s18, %s2191_s14  ;;  %p2196_p10 = scmp.lt.u32.totalorder %s2596_s18, %s2655_s4 }
 0x159   : > { %p2197_p11 = scmp.lt.u32.totalorder %s2195_s24, %s2191_s14  ;;  %p2199_p13 = scmp.lt.u32.totalorder %s2191_s14, %s2596_s18 }
 0x15a   : > { %p2193_p7 = pnand %p2192_p6, %p2325_p4 }
 0x15b   : > { %p2198_p12 = por %p2197_p11, %p2196_p10 }
 0x15c   : > { %p2194_p9 = pneg %p2193_p7 }
 0x15d   : > { %p2200_p0 = por %p2199_p13, %p2198_p12 }
 0x15f   : > { %p2201_p1 = pnand %p2200_p0, %p2194_p9 }
 0x161   : > { %2204 = shalt.err (!%p2201_p1)
}
 0x162   : > { %s2258_s30 = smov 128   ;;  %s2259_s5 = smov 8  }
 0x163   : > { %2069 = dma.vmem_to_hbm [thread:$0]  (%p2325_p4), %s2598_s6, 4096, %s2596_s18, %s2605_s9, %s2258_s30, %s2258_s30, %s2259_s5  }
 0x164 PF: > { %p2075_p2 = scmp.ge.s32.totalorder %s2255_s20, 2  ;;  %s1550_s7 = sand.u32 1, %s2235_s15  }
 0x165   : > { %s1551_s8 = scalar_lea.sflag [#allocation3], %s1550_s7 }
 0x166   : > { %p2072_p3 = pnand %p2075_p2, %p2332_p8 }
 0x168   : > { %2230 = dma.done.wait (!%p2072_p3), %s1551_s8, 4096  }
 0x169   : > { %2232 = vsyncadd (!%p2072_p3), %s1551_s8, 4294963200  ;;  %s17_s20 = sadd.s32 1, %s2255_s20   ;;  %s2658_s15 = smov %s2239_s16 }
 0x16a   : > { %p14_p5 = scmp.ge.s32.totalorder %s17_s20, 4   ;;  %s2659_s16 = smov %s2243_s17 }
 0x16b   : > { %s2660_s17 = smov %s2338_s28  ;;  %s2661_s18 = smov %s2251_s19 }
 0x16c   : > { %s2662_s19 = smov %s2664_s23  ;;  %16 = sbr.rel (!%p14_p5) target bundleno = 4 (0x4), region = 84 }
 0x173   :  { %1556 = vsyncpa [#allocation3], 1 }
 0x174   :  { %1558 = vsyncpa [#allocation3 + $0x1], 1 }

</bundles_post_ra>
